<compile_context>
chip_gen: v6e
topology: v6e:2x2x1
jax: 0.10.0
libtpu: 0.0.40
codegen_flags: <defaults>
</compile_context>

<pallas_src>
import jax
import jax.numpy as jnp
from jax.experimental import pallas as pl
from jax.experimental.pallas import tpu as pltpu
import numpy as np


def dan_kernel(x_ref, y_ref, table_ref, w_ref, b_ref, loss_ref, correct_ref):
    x = x_ref[...]                                   # (BT, S) int32 token ids
    bt, s = x.shape
    v = table_ref.shape[0]

    # ---- fused embedding gather + sum-pool over the sequence --------------
    # counts[b, t] = #occurrences of token t in row b (0/1 sums -> exact)
    # pooled[b, :] = counts[b] @ table  ==  sum_s table[x[b, s], :]
    # TODO(synk): for large vocabularies replace the one-hot/count matmul with
    # an in-kernel jnp.take / DMA gather (O(V) per row is only cheap for small V).
    vocab = jax.lax.broadcasted_iota(jnp.int32, (bt, s, v), 2)
    onehot = (x[:, :, None] == vocab).astype(jnp.float32)            # (BT, S, V)
    counts = jnp.sum(onehot, axis=1)                                  # (BT, V)
    pooled = jnp.dot(counts, table_ref[...],
                     preferred_element_type=jnp.float32)              # (BT, E)

    # ---- fused fc2(fc1(mean)) : single (E,2) affine, 1/S folded into w ----
    # C == 2 -> two VPU multiply + lane-reduce dot products (keep MXU out of
    # an N=2 matmul).
    w = w_ref[...]                                                    # (2, E)
    z0 = jnp.sum(pooled * w[0:1, :], axis=-1, keepdims=True) + b_ref[0:1, :]
    z1 = jnp.sum(pooled * w[1:2, :], axis=-1, keepdims=True) + b_ref[1:2, :]

    y = y_ref[...]                                                    # (BT, 1) int32

    # ---- two-class cross-entropy (partial sum over this tile) -------------
    mx = jnp.maximum(z0, z1)
    lse = mx + jnp.log(1.0 + jnp.exp(-jnp.abs(z1 - z0)))              # logsumexp
    picked = jnp.where(y == 1, z1, z0)
    loss_sum = jnp.sum(lse - picked)

    # ---- argmax over the 2 classes + correct count -------------------------
    pred = (z1 > z0).astype(jnp.int32)                                # ties -> class 0
    correct = jnp.sum((pred == y).astype(jnp.int32))

    # Lane-dense (8,128) partial-result blocks; reduced in the wrapper.
    loss_ref[...] = jnp.broadcast_to(loss_sum, loss_ref.shape)
    correct_ref[...] = jnp.broadcast_to(correct, correct_ref.shape)


def dan_forward(data_X, data_y, embedding_matrix, w1, b1, w2, b2, *, b_tile=8):
    """Embedding-gather + pool + fused fc1/fc2 + CE loss + accuracy, all in-kernel."""
    B, S = data_X.shape
    V, E = embedding_matrix.shape
    C = w2.shape[0]
    assert C == 2, "DAN's fc2 produces 2 classes"

    if b_tile % 8 != 0 or B % b_tile != 0:
        b_tile = B                                   # fall back to a single tile
    num_tiles = B // b_tile

    # One-time algebraic fusion in the wrapper (no nonlinearity between fc1/fc2),
    # with the 1/S mean-pool scale folded into the weights:
    #   h2 = (sum_emb/S @ W1^T + b1) @ W2^T + b2
    #      = sum_emb @ (W1^T @ W2^T / S) + (b1 @ W2^T + b2)
    w_fused = ((w1.T @ w2.T) / float(S)).T.astype(jnp.float32)        # (2, E)
    b_fused = (b1 @ w2.T + b2).reshape(2, 1).astype(jnp.float32)      # (2, 1)

    x = data_X.astype(jnp.int32)
    y2d = data_y.astype(jnp.int32).reshape(B, 1)
    table = embedding_matrix.astype(jnp.float32)
    # TODO(synk): dropout is a no-op here (forward default dropout=0.0).

    grid_spec = pltpu.PrefetchScalarGridSpec(
        num_scalar_prefetch=0,
        grid=(num_tiles,),
        in_specs=[
            pl.BlockSpec((b_tile, S), lambda i: (i, 0)),   # token ids (pipelined per tile)
            pl.BlockSpec((b_tile, 1), lambda i: (i, 0)),   # labels, same pipeline stage as x
            pl.BlockSpec((V, E), lambda i: (0, 0)),        # embedding table, VMEM-resident
            pl.BlockSpec((2, E), lambda i: (0, 0)),        # fused (fc2∘fc1)/S weights
            pl.BlockSpec((2, 1), lambda i: (0, 0)),        # fused bias
        ],
        out_specs=(
            pl.BlockSpec((8, 128), lambda i: (i, 0)),      # per-tile loss-sum (lane dense)
            pl.BlockSpec((8, 128), lambda i: (i, 0)),      # per-tile correct-count
        ),
    )

    flops = 2 * B * V * E + B * S * V + 4 * B * E
    cost_est = pl.CostEstimate(
        flops=flops,
        transcendentals=2 * B,
        bytes_accessed=(x.size + y2d.size + table.size + w_fused.size
                        + b_fused.size + 2 * num_tiles * 8 * 128) * 4,
    )

    loss_parts, correct_parts = pl.pallas_call(
        dan_kernel,
        out_shape=(jax.ShapeDtypeStruct((num_tiles * 8, 128), jnp.float32),
                   jax.ShapeDtypeStruct((num_tiles * 8, 128), jnp.int32)),
        grid_spec=grid_spec,
        compiler_params=pltpu.CompilerParams(
            dimension_semantics=("parallel",),             # independent tiles -> both TCs on v7x
            vmem_limit_bytes=32 * 1024 * 1024,
        ),
        cost_estimate=cost_est,
    )(x, y2d, table, w_fused, b_fused)

    cost = jnp.sum(loss_parts[::8, 0]) / jnp.float32(B)    # mean CE over the batch
    correct = jnp.sum(correct_parts[::8, 0])
    return cost, correct


def _reference(data_X, data_y, embedding_matrix, w1, b1, w2, b2):
    emb = jnp.take(embedding_matrix, data_X, axis=0)
    av = jnp.mean(emb, axis=1)
    h1 = av @ w1.T + b1
    h2 = h1 @ w2.T + b2
    logp = jax.nn.log_softmax(h2, axis=-1)
    cost = -jnp.mean(logp[jnp.arange(h2.shape[0]), data_y])
    pred = jnp.argmax(h2, axis=-1)
    correct = jnp.sum((pred == data_y).astype(jnp.int32))
    return cost, correct


if __name__ == "__main__":
    # Small, deterministic problem sizes (multiple batch tiles to exercise the grid).
    V, E, H, C = 50, 32, 32, 2       # vocab, embedding, hidden, classes
    B, S = 32, 8                     # batch, sequence length
    B_TILE = 8                       # 4 grid steps

    key = jax.random.PRNGKey(0)
    k_emb, k_w1, k_b1, k_w2, k_b2, k_x, k_y = jax.random.split(key, 7)

    embedding_matrix = jax.random.normal(k_emb, (V, E), dtype=jnp.float32) * 0.1
    w1 = jax.random.normal(k_w1, (H, E), dtype=jnp.float32) * 0.1   # fc1.weight
    b1 = jax.random.normal(k_b1, (H,), dtype=jnp.float32) * 0.1     # fc1.bias
    w2 = jax.random.normal(k_w2, (C, H), dtype=jnp.float32) * 0.1   # fc2.weight
    b2 = jax.random.normal(k_b2, (C,), dtype=jnp.float32) * 0.1     # fc2.bias

    data_X = jax.random.randint(k_x, (B, S), 0, V, dtype=jnp.int32)
    data_y = jax.random.randint(k_y, (B,), 0, C, dtype=jnp.int32)

    cost, correct = dan_forward(data_X, data_y, embedding_matrix,
                                w1, b1, w2, b2, b_tile=B_TILE)
    cost = jax.block_until_ready(cost)
    correct = jax.block_until_ready(correct)

    ref_cost, ref_correct = _reference(data_X, data_y, embedding_matrix,
                                       w1, b1, w2, b2)
    np.testing.assert_allclose(np.asarray(cost), np.asarray(ref_cost),
                               rtol=1e-4, atol=1e-5)
    assert int(correct) == int(ref_correct)

    print("KERNEL_OK")
</pallas_src>

<mosaic_0001>
module attributes {stable_mosaic.version = 11 : i64} {
  func.func @dan_kernel(%arg0: i32, %arg1: memref<8x8xi32, #tpu.memory_space<vmem>>, %arg2: memref<8x1xi32, #tpu.memory_space<vmem>>, %arg3: memref<50x32xf32, #tpu.memory_space<vmem>>, %arg4: memref<2x32xf32, #tpu.memory_space<vmem>>, %arg5: memref<2x1xf32, #tpu.memory_space<vmem>>, %arg6: memref<8x128xf32, #tpu.memory_space<vmem>>, %arg7: memref<8x128xi32, #tpu.memory_space<vmem>>) attributes {dimension_semantics = [#tpu.dimension_semantics<parallel>], iteration_bounds = array<i64: 4>, scalar_prefetch = 0 : i64, scratch_operands = 0 : i64, tpu.core_type = #tpu.core_type<tc>, window_params = [{transform_indices = @transform_0, window_bounds = array<i64: 8, 8>}, {transform_indices = @transform_1, window_bounds = array<i64: 8, 1>}, {pipeline_mode = #tpu.pipeline_mode<synchronous>, transform_indices = @transform_2, window_bounds = array<i64: 50, 32>}, {pipeline_mode = #tpu.pipeline_mode<synchronous>, transform_indices = @transform_3, window_bounds = array<i64: 2, 32>}, {pipeline_mode = #tpu.pipeline_mode<synchronous>, transform_indices = @transform_4, window_bounds = array<i64: 2, 1>}, {transform_indices = @transform_5, window_bounds = array<i64: 8, 128>}, {transform_indices = @transform_6, window_bounds = array<i64: 8, 128>}]} {
    %c0 = arith.constant 0 : index
    %c0_0 = arith.constant 0 : index
    %0 = vector.load %arg1[%c0, %c0_0] : memref<8x8xi32, #tpu.memory_space<vmem>>, vector<8x8xi32>
    %1 = tpu.iota {dimensions = array<i32: 2>} : vector<8x8x50xi32>
    %2 = vector.shape_cast %0 : vector<8x8xi32> to vector<8x8x1xi32>
    %3 = vector.broadcast %2 : vector<8x8x1xi32> to vector<8x8x50xi32>
    %4 = arith.cmpi eq, %3, %1 : vector<8x8x50xi32>
    %5 = arith.extui %4 : vector<8x8x50xi1> to vector<8x8x50xi32>
    %6 = arith.sitofp %5 : vector<8x8x50xi32> to vector<8x8x50xf32>
    %cst = arith.constant dense<0.000000e+00> : vector<8x50xf32>
    %7 = vector.multi_reduction <add>, %6, %cst [1] : vector<8x8x50xf32> to vector<8x50xf32>
    %c0_1 = arith.constant 0 : index
    %c0_2 = arith.constant 0 : index
    %8 = vector.load %arg3[%c0_1, %c0_2] : memref<50x32xf32, #tpu.memory_space<vmem>>, vector<50x32xf32>
    %cst_3 = arith.constant dense<0.000000e+00> : vector<8x32xf32>
    %9 = tpu.matmul %7, %8, %cst_3 {dimension_numbers = #tpu.dot_dimension_numbers<[1], [0], [0], [1], [0, 0, 1, 1], [], []>} : vector<8x50xf32>, vector<50x32xf32>, vector<8x32xf32> -> vector<8x32xf32>
    %c0_4 = arith.constant 0 : index
    %c0_5 = arith.constant 0 : index
    %10 = vector.load %arg4[%c0_4, %c0_5] : memref<2x32xf32, #tpu.memory_space<vmem>>, vector<2x32xf32>
    %11 = vector.extract_strided_slice %10 {offsets = [0, 0], sizes = [1, 32], strides = [1, 1]} : vector<2x32xf32> to vector<1x32xf32>
    %12 = vector.broadcast %11 : vector<1x32xf32> to vector<8x32xf32>
    %13 = arith.mulf %9, %12 : vector<8x32xf32>
    %cst_6 = arith.constant dense<0.000000e+00> : vector<8xf32>
    %14 = vector.multi_reduction <add>, %13, %cst_6 [1] : vector<8x32xf32> to vector<8xf32>
    %15 = vector.shape_cast %14 : vector<8xf32> to vector<8x1xf32>
    %c0_7 = arith.constant 0 : index
    %c0_8 = arith.constant 0 : index
    %16 = vector.load %arg5[%c0_7, %c0_8] : memref<2x1xf32, #tpu.memory_space<vmem>>, vector<1x1xf32>
    %17 = vector.broadcast %16 : vector<1x1xf32> to vector<8x1xf32>
    %18 = arith.addf %15, %17 : vector<8x1xf32>
    %19 = vector.extract_strided_slice %10 {offsets = [1, 0], sizes = [1, 32], strides = [1, 1]} : vector<2x32xf32> to vector<1x32xf32>
    %20 = vector.broadcast %19 : vector<1x32xf32> to vector<8x32xf32>
    %21 = arith.mulf %9, %20 : vector<8x32xf32>
    %cst_9 = arith.constant dense<0.000000e+00> : vector<8xf32>
    %22 = vector.multi_reduction <add>, %21, %cst_9 [1] : vector<8x32xf32> to vector<8xf32>
    %23 = vector.shape_cast %22 : vector<8xf32> to vector<8x1xf32>
    %c1 = arith.constant 1 : index
    %c0_10 = arith.constant 0 : index
    %24 = vector.load %arg5[%c1, %c0_10] : memref<2x1xf32, #tpu.memory_space<vmem>>, vector<1x1xf32>
    %25 = vector.broadcast %24 : vector<1x1xf32> to vector<8x1xf32>
    %26 = arith.addf %23, %25 : vector<8x1xf32>
    %c0_11 = arith.constant 0 : index
    %c0_12 = arith.constant 0 : index
    %27 = vector.load %arg2[%c0_11, %c0_12] : memref<8x1xi32, #tpu.memory_space<vmem>>, vector<8x1xi32>
    %28 = arith.maximumf %18, %26 : vector<8x1xf32>
    %29 = arith.subf %26, %18 : vector<8x1xf32>
    %30 = math.absf %29 : vector<8x1xf32>
    %cst_13 = arith.constant 0.000000e+00 : f32
    %31 = vector.broadcast %cst_13 : f32 to vector<8x1xf32>
    %32 = arith.subf %31, %30 : vector<8x1xf32>
    %33 = math.exp %32 : vector<8x1xf32>
    %cst_14 = arith.constant 1.000000e+00 : f32
    %34 = vector.broadcast %cst_14 : f32 to vector<8x1xf32>
    %35 = arith.addf %34, %33 : vector<8x1xf32>
    %36 = math.log %35 : vector<8x1xf32>
    %37 = arith.addf %28, %36 : vector<8x1xf32>
    %c1_i32 = arith.constant 1 : i32
    %38 = vector.broadcast %c1_i32 : i32 to vector<8x1xi32>
    %39 = arith.cmpi eq, %27, %38 : vector<8x1xi32>
    %40 = arith.select %39, %26, %18 : vector<8x1xi1>, vector<8x1xf32>
    %41 = arith.subf %37, %40 : vector<8x1xf32>
    %42 = vector.shape_cast %41 : vector<8x1xf32> to vector<1x8x1xf32>
    %cst_15 = arith.constant dense<0.000000e+00> : vector<1xf32>
    %43 = vector.multi_reduction <add>, %42, %cst_15 [1, 2] : vector<1x8x1xf32> to vector<1xf32>
    %44 = vector.shape_cast %43 : vector<1xf32> to vector<1x1x1xf32>
    %45 = vector.extract %44[0, 0, 0] : f32 from vector<1x1x1xf32>
    %46 = arith.cmpf ogt, %26, %18 : vector<8x1xf32>
    %47 = arith.extui %46 : vector<8x1xi1> to vector<8x1xi32>
    %48 = arith.cmpi eq, %47, %27 : vector<8x1xi32>
    %49 = arith.extui %48 : vector<8x1xi1> to vector<8x1xi32>
    %50 = vector.shape_cast %49 : vector<8x1xi32> to vector<1x8x1xi32>
    %cst_16 = arith.constant dense<0> : vector<1xi32>
    %51 = vector.multi_reduction <add>, %50, %cst_16 [1, 2] : vector<1x8x1xi32> to vector<1xi32>
    %52 = vector.shape_cast %51 : vector<1xi32> to vector<1x1x1xi32>
    %53 = vector.extract %52[0, 0, 0] : i32 from vector<1x1x1xi32>
    %54 = vector.broadcast %45 : f32 to vector<8x128xf32>
    %c0_17 = arith.constant 0 : index
    %c0_18 = arith.constant 0 : index
    %55 = vector.load %arg6[%c0_17, %c0_18] : memref<8x128xf32, #tpu.memory_space<vmem>>, vector<8x128xf32>
    tpu.vector_store %arg6[%c0_17, %c0_18], %54 {strides = array<i32>} : memref<8x128xf32, #tpu.memory_space<vmem>>, vector<8x128xf32>,
    %56 = vector.broadcast %53 : i32 to vector<8x128xi32>
    %c0_19 = arith.constant 0 : index
    %c0_20 = arith.constant 0 : index
    %57 = vector.load %arg7[%c0_19, %c0_20] : memref<8x128xi32, #tpu.memory_space<vmem>>, vector<8x128xi32>
    tpu.vector_store %arg7[%c0_19, %c0_20], %56 {strides = array<i32>} : memref<8x128xi32, #tpu.memory_space<vmem>>, vector<8x128xi32>,
    return
  }
  func.func @transform_0(%arg0: i32) -> (i32, i32) {
    %c0_i32 = arith.constant 0 : i32
    %c0_i32_0 = arith.constant 0 : i32
    return %arg0, %c0_i32 : i32, i32
  }
  func.func @transform_1(%arg0: i32) -> (i32, i32) {
    %c0_i32 = arith.constant 0 : i32
    %c0_i32_0 = arith.constant 0 : i32
    return %arg0, %c0_i32 : i32, i32
  }
  func.func @transform_2(%arg0: i32) -> (i32, i32) {
    %c0_i32 = arith.constant 0 : i32
    %c0_i32_0 = arith.constant 0 : i32
    %c0_i32_1 = arith.constant 0 : i32
    return %c0_i32, %c0_i32_0 : i32, i32
  }
  func.func @transform_3(%arg0: i32) -> (i32, i32) {
    %c0_i32 = arith.constant 0 : i32
    %c0_i32_0 = arith.constant 0 : i32
    %c0_i32_1 = arith.constant 0 : i32
    return %c0_i32, %c0_i32_0 : i32, i32
  }
  func.func @transform_4(%arg0: i32) -> (i32, i32) {
    %c0_i32 = arith.constant 0 : i32
    %c0_i32_0 = arith.constant 0 : i32
    %c0_i32_1 = arith.constant 0 : i32
    return %c0_i32, %c0_i32_0 : i32, i32
  }
  func.func @transform_5(%arg0: i32) -> (i32, i32) {
    %c0_i32 = arith.constant 0 : i32
    %c0_i32_0 = arith.constant 0 : i32
    return %arg0, %c0_i32 : i32, i32
  }
  func.func @transform_6(%arg0: i32) -> (i32, i32) {
    %c0_i32 = arith.constant 0 : i32
    %c0_i32_0 = arith.constant 0 : i32
    return %arg0, %c0_i32 : i32, i32
  }
}

</mosaic_0001>

<bundles_post_ra>
// kernel: tpu_custom_call.1
= control target key start
LH: loop header
LB: loop body
LE: loop exit
PB: predicated region body
PF: predicated region fallthrough
CT: control target
= control target key end

     0   :  { %s1194_s0 = inlined_call_operand.vmem [shape: s32[32,8], index: 0, kind: input, shape index: {}]   ;;  %s1195_s1 = inlined_call_operand.vmem [shape: s32[32,1], index: 1, kind: input, shape index: {}]   ;;  %s1196_s2 = inlined_call_operand.vmem [shape: f32[50,32], index: 2, kind: input, shape index: {}]   ;;  %s1197_s3 = inlined_call_operand.vmem [shape: f32[2,32], index: 3, kind: input, shape index: {}]   ;;  %s1198_s4 = inlined_call_operand.vmem [shape: f32[2,1], index: 4, kind: input, shape index: {}]   ;;  %s1199_s5 = inlined_call_operand.hbm [shape: f32[32,128], index: 5, kind: output, shape index: {0}]   ;;  %s1200_s6 = inlined_call_operand.hbm [shape: s32[32,128], index: 6, kind: output, shape index: {1}]  }
   0x1   :  { %1201 = sst [smem:[#allocation8_spill]] %s1194_s0 }
   0x2   :  { %12 = vsyncpa [#allocation3], 0 }
   0x3   :  { %14 = vsyncpa [#allocation3 + $0x1], 0 }
   0x4   :  { %15 = vsyncpa [#allocation5], 0 }
   0x5   :  { %17 = vsyncpa [#allocation5 + $0x1], 0  ;;  %s976_s21 = smov 0   ;;  %s978_s22 = smov 0  }
   0x6   :  { %s980_s23 = smov 0   ;;  %s982_s24 = smov 0  }
   0x7 LB: > { %s997_s25 = sadd.s32 4294967295, %s934_s24   ;;  %s738_s26 = sadd.s32 4294967294, %s934_s24   ;;  %s934_s24 = sphi %s982_s24, %s1208_s24   ;;  %s930_s23 = sphi %s980_s23, %s1207_s23   ;;  %s926_s22 = sphi %s978_s22, %s1206_s22   ;;  %s922_s21 = sphi %s976_s21, %s1205_s21  }
   0x8   : > { %s1001_s27 = sadd.s32 1, %s934_s24   ;;  %s145_s28 = sadd.s32 1, %s930_s23 }
   0x9   : > { %s142_s29 = ssub.s32 %s934_s24, %s1001_s27  ;;  %p155_p0 = scmp.ne.s32.totalorder %s930_s23, %s926_s22 }
   0xa   : > { %p143_p1 = scmp.eq.s32.totalorder %s142_s29, 0  ;;  %p156_p2 = scmp.eq.s32.totalorder %s997_s25, 3 }
   0xb   : > { %p161_p3 = scmp.ne.s32.totalorder %s926_s22, %s922_s21  ;;  %p162_p4 = scmp.eq.s32.totalorder %s738_s26, 3 }
   0xc   : > { %s1012_s30 = scalar_select %p143_p1, %s930_s23, %s145_s28  }
   0xd   : > { %p1014_p5 = por %p156_p2, %p155_p0  ;;  %p1018_p6 = por %p162_p4, %p161_p3 }
   0xe   : > { %p741_p7 = scmp.ge.s32.totalorder %s934_s24, 1  ;;  %p229_p8 = scmp.lt.s32.totalorder %s934_s24, 5 }
  0x10   : > { %p230_p9 = pnand %p741_p7, %p229_p8 }
  0x11   : > { %p267_p10 = scmp.lt.s32.totalorder (!%p230_p9), %s997_s25, 3  ;;  %s1204_s0 = sld [smem:[#allocation8_spill]] (!%p230_p9) }
  0x12   : > { %233 = sbr.rel (%p230_p9) target bundleno = 794 (0x31a), region = 40  ;;  %s760_s15 = sshll.u32 (!%p230_p9), %s997_s25, 7 }
  0x13   : > { %s1126_s18 = scalar_lea.hbm (!%p230_p9), %s1199_s5, %s760_s15  ;;  %s939_s16 = smov (!%p230_p9), [#allocation2]  }
  0x14   : > { %s848_s17 = sshll.u32 (!%p230_p9), %s939_s16, 4  ;;  %s849_s17 = int_to_ptr.vmem [resolvable:$false] %s848_s17 }
  0x17   : > { %v276_v0 = vlaneseq  ;;  %v936_v1 = vmov 0.0   ;;  %s1027_s9 = scalar_select %p267_p10, %s997_s25, 3  ;;  %v421_v18 = vld [vmem:[%s1196_s2 + $0x30] sm:$0x3]  ;;  %vm446_vm0 = vcmask 1041408   ;;  %v420_v19 = vld [vmem:[%s1196_s2 + $0x28] sm:$0xff] }
  0x18   : > { %772 = vmatprep.subr.mxu0 %v936_v1  ;;  %v419_v22 = vld [vmem:[%s1196_s2 + $0x20] sm:$0xff]  ;;  %v418_v23 = vld [vmem:[%s1196_s2 + $0x18] sm:$0xff]  ;;  %v417_v24 = vld [vmem:[%s1196_s2 + $0x10] sm:$0xff]  ;;  %vm937_vm1 = vmmov 0   ;;  %vm358_vm2 = vcmask 408576   ;;  %vm430_vm9 = vcmask 1041409  }
  0x19   : > { %v1029_v2 = vshrl.u32 %v276_v0, 7  ;;  %s744_s10 = sshll.u32 %s1027_s9, 3  ;;  %773 = vmatpush3.msk.msra.mxu0 %vm446_vm0, %v421_v18  ;;  %v416_v25 = vld [vmem:[%s1196_s2 + $0x8] sm:$0xff]  ;;  %786 = vmatprep.mubr.msk.f32.mxu0 %vm937_vm1, %v936_v1  ;;  %v415_v26 = vld [vmem:[%s1196_s2] sm:$0xff]  ;;  %v277_v27 = vand.u32 127, %v276_v0  ;;  %vm432_vm12 = vcmask 1042434  }
  0x1a   : > { %s270_s13 = scalar_lea.vmem %s1204_s0, %s744_s10  ;;  %774 = vmatprep.subr.mxu0 %v936_v1  ;;  %vm434_vm13 = vcmask 1043459   ;;  %vm436_vm14 = vcmask 1044484   ;;  %vm438_vm15 = vcmask 1045509   ;;  %vm440_vm0 = vcmask 1046534   ;;  %s274_s29 = scalar_lea.vmem %s1195_s1, %s744_s10 }
  0x1b   : > { %v294_v3 = vsub.s32 2, %v1029_v2  ;;  %v280_v4 = vsub.s32 0, %v1029_v2  ;;  %v301_v5 = vsub.s32 3, %v1029_v2  ;;  %v287_v6 = vsub.s32 1, %v1029_v2  ;;  %v275_v7 = vld [vmem:[%s270_s13] sm:$0xff]  ;;  %775 = vmatpush3.msra.mxu0 %v420_v19  ;;  %s1117_s9 = sand.u32 1, %s926_s22  }
  0x1c   : > { %v315_v12 = vsub.s32 5, %v1029_v2  ;;  %v308_v13 = vsub.s32 4, %v1029_v2  ;;  %v329_v16 = vsub.s32 7, %v1029_v2  ;;  %v322_v17 = vsub.s32 6, %v1029_v2  ;;  %776 = vmatprep.subr.mxu0 %v936_v1  ;;  %s742_s10 = sshll.u32 %s1117_s9, 3  ;;  %s604_s25 = scalar_lea.sflag [#allocation3], %s1117_s9 }
  0x1d   : > { %v295_v8 = vrot.slane %v275_v7, %v294_v3  ;;  %v281_v9 = vrot.slane %v275_v7, %v280_v4  ;;  %v302_v10 = vrot.slane %v275_v7, %v301_v5  ;;  %v288_v11 = vrot.slane %v275_v7, %v287_v6  ;;  %777 = vmatpush3.msra.mxu0 %v419_v22  ;;  %s266_s11 = scalar_lea.vmem [#allocation4], %s742_s10  ;;  %s259_s13 = scalar_lea.vmem [#allocation2], %s742_s10 }
  0x1e   : > { %v316_v14 = vrot.slane %v275_v7, %v315_v12  ;;  %v309_v15 = vrot.slane %v275_v7, %v308_v13  ;;  %v330_v20 = vrot.slane %v275_v7, %v329_v16  ;;  %v323_v21 = vrot.slane %v275_v7, %v322_v17  ;;  %778 = vmatprep.subr.mxu0 %v936_v1  ;;  %s635_s12 = sshll.u32 %s266_s11, 4  ;;  %s622_s14 = sshll.u32 %s259_s13, 4  ;;  %s1121_s12 = int_to_ptr.vmem [resolvable:$true] %s635_s12  ;;  %s1128_s14 = int_to_ptr.vmem [resolvable:$true] %s622_s14 }
  0x1f   : > { %297 = vbcast.lane.b32.xlu1 %v295_v8, 256  ;;  %283 = vbcast.lane.b32.xlu0 %v281_v9, 256  ;;  %vm442_vm1 = vcmask 1047559   ;;  %s844_s10 = scalar_lea.vmem %s1128_s14, 128  ;;  %s850_s0 = scalar_lea.vmem %s849_s17, 256 }
  0x20   : > { %779 = vmatpush3.msra.mxu0 %v418_v23  ;;  %p845_p11 = scmp.ne.s32.totalorder %s1128_s14, %s844_s10  ;;  %p851_p0 = scmp.lt.s32.totalorder %s1128_s14, %s849_s17 }
  0x21   : > { %780 = vmatprep.subr.mxu0 %v936_v1  ;;  %p852_p1 = scmp.lt.s32.totalorder %s850_s0, %s844_s10 }
  0x22   : > { %781 = vmatpush3.msra.mxu0 %v417_v24  ;;  %p846_p12 = pnand %p845_p11, %p1014_p5 }
  0x23   : > { %304 = vbcast.lane.b32.xlu1 %v302_v10, 256  ;;  %290 = vbcast.lane.b32.xlu0 %v288_v11, 256  ;;  %p853_p2 = por %p852_p1, %p851_p0 }
  0x24   : > { %782 = vmatprep.subr.mxu0 %v936_v1  ;;  %p847_p13 = pneg %p846_p12 }
  0x25   : > { %783 = vmatpush3.msra.mxu0 %v416_v25 }
  0x26   : > { %784 = vmatprep.subr.mxu0 %v936_v1  ;;  %p854_p3 = pnand %p853_p2, %p847_p13 }
  0x27   : > { %318 = vbcast.lane.b32.xlu1 %v316_v14, 256  ;;  %311 = vbcast.lane.b32.xlu0 %v309_v15, 256 }
  0x28   : > { %785 = vmatpush3.msra.mxu0 %v415_v26 }
  0x2b   : > { %332 = vbcast.lane.b32.xlu1 %v330_v20, 256  ;;  %325 = vbcast.lane.b32.xlu0 %v323_v21, 256 }
  0x91   : > { %v298_v28 = vpop.permute.xlu1 %297  ;;  %v284_v29 = vpop.permute.xlu0 %283 }
  0x92   : > { %vm336_vm3 = vcmp.eq.s32.totalorder %v298_v28, %v277_v27  ;;  %vm334_vm4 = vcmp.eq.s32.totalorder %v284_v29, %v277_v27 }
  0x93   : > { %v748_v30 = vsel %vm336_vm3, 1.0, %v936_v1  ;;  %v746_v31 = vsel %vm334_vm4, 1.0, %v936_v1  ;;  %vm526_vm3 = vcmask 261120   ;;  %vm564_vm4 = vcmask 7168  }
  0x94   : > { %v373_v32 = vsel %vm358_vm2, %v748_v30, 0.0  ;;  %v359_v33 = vsel %vm358_vm2, %v746_v31, 0.0 }
  0x95   : > { %v374_v34 = vrot.slane %v373_v32, 4  ;;  %v360_v35 = vrot.slane %v359_v33, 4  ;;  %v305_v36 = vpop.permute.xlu1 %304  ;;  %v291_v37 = vpop.permute.xlu0 %290 }
  0x96   : > { %vm337_vm5 = vcmp.eq.s32.totalorder %v305_v36, %v277_v27  ;;  %vm335_vm6 = vcmp.eq.s32.totalorder %v291_v37, %v277_v27 }
  0x97   : > { %v375_v38 = vadd.f32 %v374_v34, %v373_v32  ;;  %v361_v39 = vadd.f32 %v360_v35, %v359_v33  ;;  %v749_v40 = vsel %vm337_vm5, 1.0, %v936_v1  ;;  %v747_v41 = vsel %vm335_vm6, 1.0, %v936_v1 }
  0x98   : > { %v380_v42 = vsel %vm358_vm2, %v749_v40, 0.0  ;;  %v366_v43 = vsel %vm358_vm2, %v747_v41, 0.0 }
  0x99   : > { %v376_v44 = vrot.slane %v375_v38, 2  ;;  %v362_v45 = vrot.slane %v361_v39, 2  ;;  %v381_v46 = vrot.slane %v380_v42, 4  ;;  %v367_v47 = vrot.slane %v366_v43, 4  ;;  %v319_v48 = vpop.permute.xlu1 %318  ;;  %v312_v49 = vpop.permute.xlu0 %311 }
  0x9a   : > { %vm339_vm7 = vcmp.eq.s32.totalorder %v319_v48, %v277_v27  ;;  %vm338_vm8 = vcmp.eq.s32.totalorder %v312_v49, %v277_v27 }
  0x9b   : > { %v377_v50 = vadd.f32 %v376_v44, %v375_v38  ;;  %v363_v51 = vadd.f32 %v362_v45, %v361_v39  ;;  %v382_v52 = vadd.f32 %v381_v46, %v380_v42  ;;  %v368_v53 = vadd.f32 %v367_v47, %v366_v43  ;;  %v520_v46 = vld [vmem:[%s1197_s3] sm:$0x3] }
  0x9c   : > { %v751_v54 = vsel %vm339_vm7, 1.0, %v936_v1  ;;  %v750_v55 = vsel %vm338_vm8, 1.0, %v936_v1  ;;  %v524_v47 = vrot.slane %v520_v46, %v280_v4  ;;  %v539_v48 = vrot.slane %v520_v46, %v287_v6  ;;  %v756_v4 = vld [vmem:[%s1198_s4] ss:$0 sm:$0xff] }
  0x9d   : > { %v383_v56 = vrot.slane %v382_v52, 2  ;;  %v369_v57 = vrot.slane %v368_v53, 2  ;;  %v333_v58 = vpop.permute.xlu1 %332  ;;  %v326_v59 = vpop.permute.xlu0 %325  ;;  %v394_v60 = vsel %vm358_vm2, %v751_v54, 0.0  ;;  %v387_v61 = vsel %vm358_vm2, %v750_v55, 0.0  ;;  %v757_v55 = vld [vmem:[%s1198_s4 + $0x1] ss:$0 sm:$0xff] }
  0x9e   : > { %vm341_vm10 = vcmp.eq.s32.totalorder %v333_v58, %v277_v27  ;;  %vm340_vm11 = vcmp.eq.s32.totalorder %v326_v59, %v277_v27  ;;  %v378_v62 = vrot.slane %v377_v50, 1  ;;  %v364_v63 = vrot.slane %v363_v51, 1  ;;  %v550_v59 = vld [vmem:[%s274_s29] sm:$0xff]  ;;  %s1133_s29 = scalar_lea.hbm %s1200_s6, %s760_s15 }
  0x9f   : > { %v384_v0 = vadd.f32 %v383_v56, %v382_v52  ;;  %v370_v3 = vadd.f32 %v369_v57, %v368_v53  ;;  %v395_v5 = vrot.slane %v394_v60, 4  ;;  %v388_v7 = vrot.slane %v387_v61, 4 }
  0xa0   : > { %v753_v8 = vsel %vm341_vm10, 1.0, %v936_v1  ;;  %v752_v9 = vsel %vm340_vm11, 1.0, %v936_v1  ;;  %v379_v17 = vadd.f32 %v378_v62, %v377_v50  ;;  %v365_v18 = vadd.f32 %v364_v63, %v363_v51 }
  0xa1   : > { %v371_v10 = vrot.slane %v370_v3, 1  ;;  %v408_v11 = vsel %vm358_vm2, %v753_v8, 0.0  ;;  %v401_v12 = vsel %vm358_vm2, %v752_v9, 0.0  ;;  %v396_v13 = vadd.f32 %v395_v5, %v394_v60 }
  0xa2   : > { %v389_v14 = vadd.f32 %v388_v7, %v387_v61  ;;  %v409_v15 = vrot.slane %v408_v11, 4  ;;  %v402_v16 = vrot.slane %v401_v12, 4  ;;  %v385_v19 = vrot.slane %v384_v0, 1 }
  0xa3   : > { %v372_v20 = vadd.f32 %v371_v10, %v370_v3  ;;  %v397_v21 = vrot.slane %v396_v13, 2  ;;  %v938_v60 = vmov 0   ;;  %vm561_vm6 = vcmp.eq.s32.totalorder %v550_v59, 1 }
  0xa4   : > { %v390_v22 = vrot.slane %v389_v14, 2  ;;  %v410_v23 = vadd.f32 %v409_v15, %v408_v11  ;;  %v403_v24 = vadd.f32 %v402_v16, %v401_v12  ;;  %v386_v29 = vadd.f32 %v385_v19, %v384_v0 }
  0xa5   : > { %v431_v1 = vsel %vm430_vm9, %v372_v20, %v365_v18  ;;  %v398_v26 = vadd.f32 %v397_v21, %v396_v13 }
  0xa6   : > { %v433_v25 = vsel %vm432_vm12, %v379_v17, %v431_v1  ;;  %v391_v27 = vadd.f32 %v390_v22, %v389_v14  ;;  %v411_v28 = vrot.slane %v410_v23, 2  ;;  %v404_v30 = vrot.slane %v403_v24, 2 }
  0xa7   : > { %v399_v31 = vrot.slane %v398_v26, 1  ;;  %v435_v35 = vsel %vm434_vm13, %v386_v29, %v433_v25 }
  0xa8   : > { %v392_v32 = vrot.slane %v391_v27, 1  ;;  %v412_v33 = vadd.f32 %v411_v28, %v410_v23  ;;  %v405_v34 = vadd.f32 %v404_v30, %v403_v24 }
  0xa9   : > { %v400_v36 = vadd.f32 %v399_v31, %v398_v26 }
  0xaa   : > { %v393_v37 = vadd.f32 %v392_v32, %v391_v27  ;;  %v413_v38 = vrot.slane %v412_v33, 1  ;;  %v406_v39 = vrot.slane %v405_v34, 1 }
  0xac   : > { %v414_v40 = vadd.f32 %v413_v38, %v412_v33  ;;  %v437_v41 = vsel %vm436_vm14, %v393_v37, %v435_v35  ;;  %v407_v42 = vadd.f32 %v406_v39, %v405_v34 }
  0xad   : > { %v439_v43 = vsel %vm438_vm15, %v400_v36, %v437_v41 }
  0xae   : > { %v441_v44 = vsel %vm440_vm0, %v407_v42, %v439_v43 }
  0xaf   : > { %v443_v45 = vsel %vm442_vm1, %v414_v40, %v441_v44 }
  0xb0   : > { %787 = vmatmul.mubr.msk.f32.vlgmr.msra.gmra.mxu0 %vm358_vm2, %v443_v45 }
 0x170   : > { %v516_v49 = vpop.f32.mrf.mxu0 }
 0x171   : > { %v525_v50 = vmul.f32 %v524_v47, %v516_v49  ;;  %v540_v51 = vmul.f32 %v539_v48, %v516_v49 }
 0x172   : > { %v788_v52 = vpop.f32.mrf.mxu0 }
 0x173   : > { %v541_v53 = vsel %vm526_vm3, %v540_v51, 0.0  ;;  %v527_v54 = vsel %vm526_vm3, %v525_v50, 0.0 }
 0x174   : > { %542 = vadd.xlane.f32.xlu1 %v541_v53  ;;  %528 = vadd.xlane.f32.xlu0 %v527_v54 }
 0x1fd   : > { %v543_v2 = vpop.xlane.xlu1 %542  ;;  %v529_v6 = vpop.xlane.xlu0 %528 }
 0x1fe   : > { %v549_v56 = vadd.f32 %v757_v55, %v543_v2  ;;  %v535_v57 = vadd.f32 %v756_v4, %v529_v6 }
 0x200   : > { %v552_v58 = vsub.f32 %v549_v56, %v535_v57  ;;  %vm575_vm2 = vcmp.gt.f32.partialorder %v549_v56, %v535_v57  ;;  %v551_v14 = vmax.f32 %v535_v57, %v549_v56  ;;  %v562_v17 = vsel %vm561_vm6, %v549_v56, %v535_v57 }
 0x201   : > { %v576_v61 = vsel %vm575_vm2, 1, %v938_v60 }
 0x202   : > { %v553_v62 = vand.u32 2147483647, %v552_v58  ;;  %vm577_vm5 = vcmp.eq.s32.totalorder %v576_v61, %v550_v59 }
 0x203   : > { %v578_v63 = vsel %vm577_vm5, 1, %v938_v60 }
 0x204   : > { %v554_v0 = vsub.f32 0.0, %v553_v62  ;;  %v579_v3 = vsel %vm564_vm4, %v578_v63, 0 }
 0x205   : > { %v581_v5 = vshrl.u32 %v579_v3, 16  ;;  %v580_v9 = vand.u32 65535, %v579_v3 }
 0x206   : > { %v555_v7 = vmul.f32 1.442695, %v554_v0 }
 0x207   : > { %v583_v8 = vcvt.s32.f32 %v581_v5  ;;  %v582_v10 = vcvt.s32.f32 %v580_v9 }
 0x208   : > { %840 = vpow2.f32 %v555_v7 }
 0x209   : > { %586 = vadd.xlane.f32.xlu0 %v583_v8 }
 0x20d   : > { %584 = vadd.xlane.f32.xlu0 %v582_v10 }
 0x215   : > { %v841_v11 = vpop.eup %840 }
 0x216   : > { %v557_v12 = vadd.f32 1.0, %v841_v11 }
 0x218   : > { %842 = vlog2.f32 %v557_v12 }
 0x225   : > { %v843_v13 = vpop.eup %842 }
 0x226   : > { %v559_v15 = vmul.f32 0.6931472, %v843_v13 }
 0x228   : > { %v560_v16 = vadd.f32 %v559_v15, %v551_v14 }
 0x22a   : > { %v563_v18 = vsub.f32 %v560_v16, %v562_v17 }
 0x22c   : > { %v565_v19 = vsel %vm564_vm4, %v563_v18, 0.0 }
 0x22d   : > { %566 = vadd.xlane.f32.xlu1 %v565_v19 }
 0x292   : > { %v587_v20 = vpop.xlane.xlu0 %586 }
 0x293   : > { %v589_v22 = vcvt.f32.s32 %v587_v20 }
 0x295   : > { %v590_v24 = vshll.u32 %v589_v22, 16 }
 0x296   : > { %v585_v21 = vpop.xlane.xlu0 %584 }
 0x297   : > { %v588_v23 = vcvt.f32.s32 %v585_v21 }
 0x299   : > { %v591_v1 = vadd.s32 %v590_v24, %v588_v23 }
 0x29b   : > { %v592_v25 = vrot.slane %v591_v1, 4 }
 0x29d   : > { %v593_v26 = vadd.s32 %v592_v25, %v591_v1 }
 0x29f   : > { %v594_v28 = vrot.slane %v593_v26, 2 }
 0x2a1   : > { %v595_v31 = vadd.s32 %v594_v28, %v593_v26 }
 0x2a3   : > { %v596_v34 = vrot.slane %v595_v31, 1 }
 0x2a5   : > { %v597_v37 = vadd.s32 %v596_v34, %v595_v31 }
 0x2b6   : > { %v567_v27 = vpop.xlane.xlu1 %566 }
 0x2b7   : > { %v568_v29 = vrot.slane %v567_v27, 4 }
 0x2b9   : > { %v569_v30 = vadd.f32 %v568_v29, %v567_v27 }
 0x2bb   : > { %v570_v32 = vrot.slane %v569_v30, 2 }
 0x2bd   : > { %v571_v33 = vadd.f32 %v570_v32, %v569_v30 }
 0x2bf   : > { %v572_v35 = vrot.slane %v571_v33, 1 }
 0x2c1   : > { %v573_v36 = vadd.f32 %v572_v35, %v571_v33 }
 0x2c3   : > { %789 = vpush %v573_v36 }
 0x2c4   : > { %791 = vpush %v597_v37 }
 0x2f4   : > { %s790_s19 = spop %789 }
 0x2f5   : > { %v599_v38 = vstv %s790_s19  ;;  %s792_s20 = spop %791 }
 0x2f6   : > { %600 = vst [vmem:[%s259_s13] sm:$0xff] %v599_v38  ;;  %v601_v39 = vstv %s792_s20 }
 0x2f7   : > { %602 = vst [vmem:[%s266_s11] sm:$0xff] %v601_v39 }
 0x2f8   : > { %857 = shalt.err (!%p854_p3)
}
 0x2f9   : > { %s858_s11 = scalar_lea.hbm %s1126_s18, 128  ;;  %s862_s19 = scalar_lea.hbm %s1199_s5, 512 }
 0x2fa   : > { %p859_p4 = scmp.ne.s32.totalorder %s1126_s18, %s858_s11  ;;  %p863_p9 = scmp.lt.s32.totalorder %s1126_s18, %s1199_s5 }
 0x2fb   : > { %p864_p10 = scmp.lt.s32.totalorder %s862_s19, %s858_s11 }
 0x2fc   : > { %p860_p7 = pnand %p859_p4, %p1014_p5 }
 0x2fd   : > { %p865_p11 = por %p864_p10, %p863_p9 }
 0x2fe   : > { %p861_p8 = pneg %p860_p7 }
 0x300   : > { %p866_p12 = pnand %p865_p11, %p861_p8 }
 0x302   : > { %869 = shalt.err (!%p866_p12)
}
 0x303   : > { %793 = dma.vmem_to_hbm [thread:$0]  (%p1014_p5), %s1128_s14, 128, %s1126_s18, %s604_s25  }
 0x304   : > { %s609_s0 = scalar_lea.sflag [#allocation5], %s1117_s9  ;;  %s870_s28 = scalar_lea.vmem %s1121_s12, 128 }
 0x305   : > { %p871_p13 = scmp.ne.s32.totalorder %s1121_s12, %s870_s28  ;;  %s940_s10 = smov [#allocation4]  }
 0x306   : > { %s874_s16 = sshll.u32 %s940_s10, 4  ;;  %s875_s16 = int_to_ptr.vmem [resolvable:$false] %s874_s16 }
 0x307   : > { %p872_p0 = pnand %p871_p13, %p1014_p5  ;;  %s876_s17 = scalar_lea.vmem %s875_s16, 256 }
 0x308   : > { %p877_p2 = scmp.lt.s32.totalorder %s1121_s12, %s875_s16  ;;  %p878_p3 = scmp.lt.s32.totalorder %s876_s17, %s870_s28 }
 0x309   : > { %p873_p1 = pneg %p872_p0 }
 0x30a   : > { %p879_p4 = por %p878_p3, %p877_p2 }
 0x30c   : > { %p880_p7 = pnand %p879_p4, %p873_p1 }
 0x30e   : > { %883 = shalt.err (!%p880_p7)
}
 0x30f   : > { %s884_s14 = scalar_lea.hbm %s1133_s29, 128  ;;  %s888_s25 = scalar_lea.hbm %s1200_s6, 512 }
 0x310   : > { %p885_p8 = scmp.ne.s32.totalorder %s1133_s29, %s884_s14  ;;  %p889_p11 = scmp.lt.s32.totalorder %s1133_s29, %s1200_s6 }
 0x311   : > { %p890_p12 = scmp.lt.s32.totalorder %s888_s25, %s884_s14 }
 0x312   : > { %p886_p9 = pnand %p885_p8, %p1014_p5 }
 0x313   : > { %p891_p13 = por %p890_p12, %p889_p11 }
 0x314   : > { %p887_p10 = pneg %p886_p9 }
 0x316   : > { %p892_p0 = pnand %p891_p13, %p887_p10 }
 0x318   : > { %895 = shalt.err (!%p892_p0)
}
 0x319   : > { %794 = dma.vmem_to_hbm [thread:$0]  (%p1014_p5), %s1121_s12, 128, %s1133_s29, %s609_s0  }
 0x31a PF: > { %p804_p1 = scmp.ge.s32.totalorder %s934_s24, 2  ;;  %s647_s15 = sand.u32 1, %s922_s21  }
 0x31b   : > { %s648_s19 = scalar_lea.sflag [#allocation3], %s647_s15 }
 0x31c   : > { %p798_p2 = pnand %p804_p1, %p1018_p6 }
 0x31e   : > { %p799_p3 = pneg %p798_p2 }
 0x320   : > { %913 = dma.done.wait (%p799_p3), %s648_s19, 128  }
 0x321   : > { %915 = vsyncadd (%p799_p3), %s648_s19, 4294967168  ;;  %s657_s20 = scalar_lea.sflag [#allocation5], %s647_s15 }
 0x322   : > { %917 = dma.done.wait (%p799_p3), %s657_s20, 128  }
 0x323   : > { %919 = vsyncadd (%p799_p3), %s657_s20, 4294967168  ;;  %p20_p5 = scmp.ge.s32.totalorder %s1001_s27, 6   ;;  %s1205_s21 = smov %s926_s22 }
 0x324   : > { %s1206_s22 = smov %s930_s23  ;;  %s1207_s23 = smov %s1012_s30 }
 0x325   : > { %s1208_s24 = smov %s1001_s27  ;;  %22 = sbr.rel (!%p20_p5) target bundleno = 7 (0x7), region = 95 }
 0x32a   :  { %662 = vsyncpa [#allocation3], 1 }
 0x32b   :  { %664 = vsyncpa [#allocation3 + $0x1], 1 }
 0x32c   :  { %665 = vsyncpa [#allocation5], 1 }
 0x32d   :  { %667 = vsyncpa [#allocation5 + $0x1], 1 }

</bundles_post_ra>
